<compile_context>
chip_gen: v6e
topology: v6e:2x2x1
jax: 0.10.0
libtpu: 0.0.40
codegen_flags: <defaults>
</compile_context>

<pallas_src>
import functools

import jax
import jax.numpy as jnp
from jax.experimental import pallas as pl
from jax.experimental.pallas import tpu as pltpu


def _cdiv(a, b):
    return -(-a // b)


def _make_kernel(D, lane_aligned):
    def kernel(x1_ref, x2_ref, o_ref):
        # x1_ref: (tB, D) query rows, x2_ref: (tS, D) support rows,
        # o_ref : (tB, tS, 2D) output block.
        tB = x1_ref.shape[0]
        tS = x2_ref.shape[0]
        x1b = jnp.broadcast_to(x1_ref[...][:, None, :], (tB, tS, D))
        x2b = jnp.broadcast_to(x2_ref[...][None, :, :], (tB, tS, D))
        if lane_aligned:
            # Each half is a whole number of 128-lane groups -> two direct,
            # unmasked slab stores, no concatenate intermediate.
            o_ref[:, :, :D] = x1b
            o_ref[:, :, D:] = x2b
        else:
            # A half-row store would be lane-masked (vst.msk) and halve the
            # effective vreg->VMEM store bandwidth, which binds on v7x's
            # higher per-TC HBM BW.  Build the full 2D-wide row in vregs and
            # issue full-width stores; the lane placement rides XLU/VPU slots.
            o_ref[...] = jnp.concatenate([x1b, x2b], axis=-1)
        # TODO(synk): if profiles ever show VMEM spills for very large blocks,
        # switch to a lax.fori_loop over tB writing one (tS, 2D) slab per row.

    return kernel


def _pick_tiles(B, S, D, itemsize, out_tile_bytes):
    """Choose (tB, tS) for (tB, tS, 2D) output blocks.

    Legality: a split tile must be a multiple of 8 (sublane) or the full axis.
    Policy for a write-bound broadcast-concat:
      * keep the output block near `out_tile_bytes` (Pallas double-buffers it),
      * prefer tS == S (x2 resident, contiguous writeback), split B,
      * otherwise reserve tB >= min(B, granule) first, then give the rest to tS,
      * round split tiles to the dtype packing granule g (8/16/32 rows),
      * only exceed the budget when both axes are already at their legal floor
        (the caller sizes vmem_limit_bytes from the actual tiles).
    """
    g = max(8, 32 // itemsize)          # sublane packing granule of out dtype
    row_bytes = 2 * D * itemsize        # one (b, s) output row
    budget_rows = max(1, out_tile_bytes // row_bytes)

    b_floor = B if B <= g else g        # smallest "nice" legal tB
    s_floor = S if S <= 8 else 8        # smallest legal tS

    if S * b_floor <= budget_rows:
        # Full support axis fits alongside >= b_floor query rows.
        tS = S
        tb_budget = budget_rows // S    # >= b_floor by construction
        if B <= tb_budget:
            tB = B
        else:
            tB = (tb_budget // g) * g   # >= g >= 8 here, and within budget
    else:
        # Support axis must be split: reserve the B axis first (caps x2
        # re-reads at ~1/tB), then spend the remaining budget on tS.
        tB = b_floor
        rows_per_b = max(1, budget_rows // tB)
        if rows_per_b >= g:
            tS = min(S, (rows_per_b // g) * g)
        elif rows_per_b >= 8:
            tS = min(S, (rows_per_b // 8) * 8)
        else:
            tS = s_floor                # legal floor; may overshoot (rare, huge D)
    return tB, tS


def _force_multi_step(B, S, tB, tS, row_bytes, g,
                      min_bytes=1 << 20, target_steps=4):
    """Ensure multi-MiB problems don't collapse to a 1x1 grid (v7x has 2 TCs;
    'parallel' semantics only help with >= 2 grid steps)."""
    total = B * S * row_bytes
    if total < min_bytes:
        return tB, tS
    if _cdiv(B, tB) * _cdiv(S, tS) >= 2:
        return tB, tS
    if B > 8:                                         # prefer splitting B
        new_tB = max(8, 8 * _cdiv(B, 8 * target_steps))
        if new_tB < B:
            return min(tB, new_tB), tS
    if S > g:                                         # else split S (g-rounded)
        new_tS = max(g, g * _cdiv(S, g * target_steps))
        if new_tS < S:
            return tB, min(tS, new_tS)
    return tB, tS


@functools.partial(jax.jit, static_argnames=("out_tile_bytes",))
def support_feature_concat(x1, x2, *, out_tile_bytes=4 * 1024 * 1024):
    """Pallas equivalent of _SupportFeatureConcat.forward for 2-D features."""
    B, D = x1.shape
    S, D2 = x2.shape
    if D != D2:
        raise ValueError(f"feature dims of x1 ({D}) and x2 ({D2}) must match")

    # torch.cat type-promotes; do the same instead of silently casting x2.
    out_dtype = jnp.result_type(x1.dtype, x2.dtype)
    x1 = x1.astype(out_dtype)
    x2 = x2.astype(out_dtype)
    itemsize = jnp.dtype(out_dtype).itemsize

    out_tile_bytes = max(64 * 1024, int(out_tile_bytes))   # sane lower clamp
    g = max(8, 32 // itemsize)
    row_bytes = 2 * D * itemsize

    tB, tS = _pick_tiles(B, S, D, itemsize, out_tile_bytes)
    tB, tS = _force_multi_step(B, S, tB, tS, row_bytes, g)

    grid_b = _cdiv(B, tB)
    grid_s = _cdiv(S, tS)

    # Size the scoped-VMEM limit from the *actual* (double-buffered) tiles so
    # we never depend on per-generation defaults (v5e 16 / v6e 32 / v7x 32 MiB).
    out_blk = tB * tS * 2 * D * itemsize
    x1_blk = tB * D * itemsize
    x2_blk = tS * D * itemsize
    needed = 2 * (out_blk + x1_blk + x2_blk) + (2 << 20)   # +slack for vregs
    vmem_limit = int(min(max(needed, 32 << 20), 128 << 20))

    out_bytes = B * S * 2 * D * itemsize
    cost = pl.CostEstimate(
        flops=0,
        transcendentals=0,
        bytes_accessed=out_bytes
        + grid_s * B * D * itemsize        # x1 re-read once per S-tile column
        + grid_b * S * D * itemsize,       # x2 re-read once per B-tile row
    )

    return pl.pallas_call(
        _make_kernel(D, D % 128 == 0),
        out_shape=jax.ShapeDtypeStruct((B, S, 2 * D), out_dtype),
        grid=(grid_b, grid_s),
        in_specs=[
            pl.BlockSpec((tB, D), lambda i, j: (i, 0)),   # query rows
            pl.BlockSpec((tS, D), lambda i, j: (j, 0)),   # support rows
        ],
        out_specs=pl.BlockSpec((tB, tS, 2 * D), lambda i, j: (i, j, 0)),
        compiler_params=pltpu.CompilerParams(
            # Fully independent grid axes -> shard across TensorCores (v7x).
            dimension_semantics=("parallel", "parallel"),
            vmem_limit_bytes=vmem_limit,
        ),
        cost_estimate=cost,
    )(x1, x2)


def _reference(x1, x2):
    out_dtype = jnp.result_type(x1.dtype, x2.dtype)
    B = x1.shape[0]
    x2e = jnp.broadcast_to(x2[None], (B,) + x2.shape)       # x2.expand(B, -1, -1)
    x1e = jnp.broadcast_to(x1[:, None, :], x2e.shape)       # x1.unsqueeze(1).expand_as
    return jnp.concatenate([x1e, x2e], axis=2).astype(out_dtype)


if __name__ == "__main__":
    key = jax.random.PRNGKey(0)
    keys = jax.random.split(key, 8)

    # 1) Small shapes consistent with the module: 2 queries x 8 support x 32 dims.
    #    Single grid step; exercises the non-lane-aligned (concatenate) store path.
    B, S, D = 2, 8, 32
    x1 = jax.random.normal(keys[0], (B, D), dtype=jnp.float32)
    x2 = jax.random.normal(keys[1], (S, D), dtype=jnp.float32)
    out = support_feature_concat(x1, x2)
    jax.block_until_ready(out)
    assert out.shape == (B, S, 2 * D)
    assert jnp.array_equal(out, _reference(x1, x2))

    # 2) Tiled multi-step path (split-S branch, tB>=8 reserved first) via a
    #    tiny per-tile byte budget; D=64 -> concatenate store path.
    B2, S2, D2 = 16, 64, 64
    y1 = jax.random.normal(keys[2], (B2, D2), dtype=jnp.float32)
    y2 = jax.random.normal(keys[3], (S2, D2), dtype=jnp.float32)
    out2 = support_feature_concat(y1, y2, out_tile_bytes=16 * 1024)
    jax.block_until_ready(out2)
    assert out2.shape == (B2, S2, 2 * D2)
    assert jnp.array_equal(out2, _reference(y1, y2))

    # 3) Lane-aligned D (two unmasked slab stores) + forced >=2 grid steps for a
    #    multi-MiB output (tS = S full, B split -> grid (4, 1)).
    B3, S3, D3 = 32, 128, 128
    z1 = jax.random.normal(keys[4], (B3, D3), dtype=jnp.float32)
    z2 = jax.random.normal(keys[5], (S3, D3), dtype=jnp.float32)
    out3 = support_feature_concat(z1, z2)
    jax.block_until_ready(out3)
    assert out3.shape == (B3, S3, 2 * D3)
    assert jnp.array_equal(out3, _reference(z1, z2))

    # 4) bf16 inputs -> bf16 output (16-row packing granule path).
    B4, S4, D4 = 4, 16, 64
    w1 = jax.random.normal(keys[6], (B4, D4), dtype=jnp.bfloat16)
    w2 = jax.random.normal(keys[7], (S4, D4), dtype=jnp.bfloat16)
    out4 = support_feature_concat(w1, w2)
    jax.block_until_ready(out4)
    assert out4.shape == (B4, S4, 2 * D4)
    assert out4.dtype == jnp.bfloat16
    assert jnp.array_equal(out4, _reference(w1, w2))

    print("KERNEL_OK")
</pallas_src>

<mosaic_0001>
module attributes {stable_mosaic.version = 11 : i64} {
  func.func @kernel(%arg0: i32, %arg1: i32, %arg2: memref<2x32xf32, #tpu.memory_space<vmem>>, %arg3: memref<8x32xf32, #tpu.memory_space<vmem>>, %arg4: memref<2x8x64xf32, #tpu.memory_space<vmem>>) attributes {dimension_semantics = [#tpu.dimension_semantics<parallel>, #tpu.dimension_semantics<parallel>], iteration_bounds = array<i64: 1, 1>, scalar_prefetch = 0 : i64, scratch_operands = 0 : i64, tpu.core_type = #tpu.core_type<tc>, window_params = [{transform_indices = @transform_0, window_bounds = array<i64: 2, 32>}, {transform_indices = @transform_1, window_bounds = array<i64: 8, 32>}, {transform_indices = @transform_2, window_bounds = array<i64: 2, 8, 64>}]} {
    %c0 = arith.constant 0 : index
    %c0_0 = arith.constant 0 : index
    %0 = vector.load %arg2[%c0, %c0_0] : memref<2x32xf32, #tpu.memory_space<vmem>>, vector<2x32xf32>
    %1 = vector.shape_cast %0 : vector<2x32xf32> to vector<2x1x32xf32>
    %2 = vector.shape_cast %1 : vector<2x1x32xf32> to vector<2x1x32xf32>
    %3 = vector.broadcast %2 : vector<2x1x32xf32> to vector<2x8x32xf32>
    %c0_1 = arith.constant 0 : index
    %c0_2 = arith.constant 0 : index
    %4 = vector.load %arg3[%c0_1, %c0_2] : memref<8x32xf32, #tpu.memory_space<vmem>>, vector<8x32xf32>
    %5 = vector.shape_cast %4 : vector<8x32xf32> to vector<1x8x32xf32>
    %6 = vector.shape_cast %5 : vector<1x8x32xf32> to vector<1x8x32xf32>
    %7 = vector.broadcast %6 : vector<1x8x32xf32> to vector<2x8x32xf32>
    %8 = tpu.concatenate %3, %7 in 2 : vector<2x8x32xf32>, vector<2x8x32xf32> -> vector<2x8x64xf32>
    %c0_3 = arith.constant 0 : index
    %c0_4 = arith.constant 0 : index
    %c0_5 = arith.constant 0 : index
    %9 = vector.load %arg4[%c0_3, %c0_4, %c0_5] : memref<2x8x64xf32, #tpu.memory_space<vmem>>, vector<2x8x64xf32>
    tpu.vector_store %arg4[%c0_3, %c0_4, %c0_5], %8 {strides = array<i32>} : memref<2x8x64xf32, #tpu.memory_space<vmem>>, vector<2x8x64xf32>,
    return
  }
  func.func @transform_0(%arg0: i32, %arg1: i32) -> (i32, i32) {
    %c0_i32 = arith.constant 0 : i32
    %c0_i32_0 = arith.constant 0 : i32
    return %arg0, %c0_i32 : i32, i32
  }
  func.func @transform_1(%arg0: i32, %arg1: i32) -> (i32, i32) {
    %c0_i32 = arith.constant 0 : i32
    %c0_i32_0 = arith.constant 0 : i32
    return %arg1, %c0_i32 : i32, i32
  }
  func.func @transform_2(%arg0: i32, %arg1: i32) -> (i32, i32, i32) {
    %c0_i32 = arith.constant 0 : i32
    %c0_i32_0 = arith.constant 0 : i32
    return %arg0, %arg1, %c0_i32 : i32, i32, i32
  }
}

</mosaic_0001>

<bundles_post_ra>
// kernel: support_feature_concat.1
= control target key start
LH: loop header
LB: loop body
LE: loop exit
PB: predicated region body
PF: predicated region fallthrough
CT: control target
= control target key end

     0   :  { %7 = vsyncpa [#allocation3], 0  ;;  %s204_s0 = inlined_call_operand.hbm [shape: f32[2,32], index: 0, kind: input, shape index: {}]   ;;  %s205_s1 = inlined_call_operand.hbm [shape: f32[8,32], index: 1, kind: input, shape index: {}]   ;;  %s206_s2 = inlined_call_operand.hbm [shape: f32[2,8,64], index: 2, kind: output, shape index: {}]  }
   0x1   :  { %8 = vsyncpa [#allocation6], 0 }
   0x2   :  { %9 = vsyncpa [#allocation4], 0  ;;  %s173_s9 = smov [#allocation2]   ;;  %s174_s11 = smov [#allocation5]  }
   0x3   :  { %s16_s10 = sshll.u32 %s173_s9, 4  ;;  %s26_s12 = sshll.u32 %s174_s11, 4  ;;  %s17_s10 = int_to_ptr.vmem [resolvable:$true] %s16_s10  ;;  %s27_s12 = int_to_ptr.vmem [resolvable:$true] %s26_s12 }
   0x4   :  { %s115_s13 = scalar_lea.vmem %s17_s10, 32  ;;  %p120_p1 = scmp.lt.s32.totalorder %s17_s10, %s17_s10 }
   0x5   :  { %p116_p0 = scmp.ne.s32.totalorder %s17_s10, %s115_s13  ;;  %p121_p2 = scmp.lt.s32.totalorder %s115_s13, %s115_s13 }
   0x7   :  { %p122_p3 = por %p121_p2, %p120_p1 }
   0x9   :  { %p123_p4 = pnand %p122_p3, %p116_p0 }
   0xb   :  { %126 = shalt.err (!%p123_p4)
}
   0xc   :  { %19 = dma.hbm_to_vmem [thread:$0]  %s204_s0, 32, %s17_s10, [#allocation3]  }
   0xd   :  { %s135_s16 = scalar_lea.vmem %s27_s12, 128  ;;  %p140_p6 = scmp.lt.s32.totalorder %s27_s12, %s27_s12 }
   0xe   :  { %p136_p5 = scmp.ne.s32.totalorder %s27_s12, %s135_s16  ;;  %p141_p7 = scmp.lt.s32.totalorder %s135_s16, %s135_s16 }
  0x10   :  { %p142_p8 = por %p141_p7, %p140_p6 }
  0x12   :  { %p143_p9 = pnand %p142_p8, %p136_p5 }
  0x14   :  { %146 = shalt.err (!%p143_p9)
}
  0x15   :  { %29 = dma.hbm_to_vmem [thread:$0]  %s205_s1, 128, %s27_s12, [#allocation6]  }
  0x16   :  { %167 = dma.done.wait [#allocation3], 32  }
  0x17   :  { %168 = vsyncadd [#allocation3], 4294967264 }
  0x18   :  { %169 = dma.done.wait [#allocation6], 128  }
  0x19   :  { %170 = vsyncadd [#allocation6], 4294967168  ;;  %v70_v0 = vld [vmem:[#allocation5] sm:$0xff]  ;;  %s175_s19 = smov 32   ;;  %v176_v1 = vmov 1966171168   ;;  %v49_v3 = vlaneseq }
  0x1a   :  { %72 = vrot.lane.b32.xlu0 %v70_v0, %s175_s19  ;;  %v47_v2 = vunpack.c.l.s4 %v176_v1  ;;  %v99_v6 = vld.sshfl [vmem:[#allocation2] sm:$0x11 pattern:$0x75316420]  ;;  %s177_s0 = smov [#allocation7]   ;;  %vm75_vm0 = vcmask 261120  }
  0x1b   :  { %v50_v5 = vshrl.u32 %v49_v3, 7  ;;  %v45_v7 = vcombine.high %v99_v6, %v99_v6  ;;  %s86_s1 = sshll.u32 %s177_s0, 4  ;;  %vm78_vm1 = vcmask 523264   ;;  %s87_s1 = int_to_ptr.vmem [resolvable:$true] %s86_s1 }
  0x1c   :  { %v48_v4 = vunpack.c.0.s8 %v47_v2  ;;  %s147_s20 = scalar_lea.vmem %s87_s1, 256  ;;  %p152_p11 = scmp.lt.s32.totalorder %s87_s1, %s87_s1 }
  0x1d   :  { %v62_v11 = vsub.s32 0, %v50_v5  ;;  %p148_p10 = scmp.ne.s32.totalorder %s87_s1, %s147_s20  ;;  %p153_p12 = scmp.lt.s32.totalorder %s147_s20, %s147_s20 }
  0x1e   :  { %v51_v8 = vsub.s32 %v48_v4, %v50_v5 }
  0x1f   :  { %p154_p13 = por %p153_p12, %p152_p11 }
  0x20   :  { %v52_v9 = vrot.slane %v99_v6, %v51_v8  ;;  %v59_v10 = vrot.slane %v45_v7, %v51_v8 }
  0x21   :  { %p155_p0 = pnand %p154_p13, %p148_p10 }
  0x22   :  { %v63_v12 = vrot.slane %v52_v9, %v62_v11  ;;  %v67_v13 = vrot.slane %v59_v10, %v62_v11 }
  0x8c   :  { %v73_v14 = vpop.permute.xlu0 %72 }
  0x8d   :  { %v76_v15 = vsel %vm75_vm0, %v63_v12, %v73_v14  ;;  %v77_v16 = vsel %vm75_vm0, %v67_v13, %v73_v14 }
  0x8e   :  { %79 = vst.msk [vmem:[#allocation7] sm:$0xff] %vm78_vm1, %v76_v15  ;;  %80 = vst.msk [vmem:[#allocation7 + $0x8] sm:$0xff] %vm78_vm1, %v77_v16 }
  0x8f   :  { %158 = shalt.err (!%p155_p0)
}
  0x90   :  { %s178_s21 = smov 128   ;;  %s179_s22 = smov 8  }
  0x91   :  { %92 = dma.vmem_to_hbm [thread:$0]  %s87_s1, 256, %s206_s2, [#allocation4], %s178_s21, %s178_s21, %s179_s22  }
  0x92   :  { %171 = dma.done.wait [#allocation4], 256  }
  0x93   :  { %172 = vsyncadd [#allocation4], 4294967040 }
  0x94   :  { %96 = vsyncpa [#allocation3], 1 }
  0x95   :  { %97 = vsyncpa [#allocation6], 1 }
  0x96   :  { %98 = vsyncpa [#allocation4], 1 }

</bundles_post_ra>
